<compile_context>
chip_gen: v6e
topology: v6e:2x2x1
jax: 0.10.0
libtpu: 0.0.40
codegen_flags: <defaults>
</compile_context>

<pallas_src>
import functools
import math

import jax
import jax.numpy as jnp
from jax.experimental import pallas as pl
from jax.experimental.pallas import tpu as pltpu


_ROW_ALIGN = 8       # f32 sublane alignment
_LANE_ALIGN = 128    # lane alignment


def _round_up(x, m):
    return -(-x // m) * m


@functools.lru_cache(maxsize=None)
def _hw_config():
    """(per-tile byte budget, vmem_limit cap) — generation aware.

    v7x has only 64 MiB VMEM per TensorCore (keep tiles modest, total request
    <= 32 MiB); v5e/v6e have 128 MiB physical VMEM (bigger tiles -> fewer
    ~0.35 us grid-step bubbles).  Unknown backends use conservative defaults.
    """
    try:
        info = pltpu.get_tpu_info()
        vmem = int(getattr(info, "vmem_capacity_bytes", 0) or 0)
    except Exception:
        vmem = 0
    if vmem and vmem <= (64 << 20):          # v7x-class (64 MiB / TC)
        return 4 << 20, 32 << 20
    if vmem:                                  # v5e / v6e (128 MiB physical)
        return 8 << 20, 64 << 20
    return 2 << 20, 32 << 20                  # unknown: conservative


@functools.lru_cache(maxsize=None)
def _bf16_compute_ok():
    """bf16 VPU/EUP exists on v6e/v7x but not v5e; default False if unsure."""
    try:
        info = pltpu.get_tpu_info()
        name = str(getattr(info, "chip_version", "") or
                   getattr(info, "version", "")).lower()
        return bool(name) and ("v5" not in name)
    except Exception:
        return False


def _compute_dtype(x_dtype):
    if jnp.dtype(x_dtype) == jnp.dtype(jnp.bfloat16) and _bf16_compute_ok():
        return jnp.bfloat16
    return jnp.float32


# ---------------------------------------------------------------------------
# Kernel (shared by both modes)
# ---------------------------------------------------------------------------
def _dyt_kernel(alpha_ref, x_ref, w_ref, b_ref, o_ref, *, compute_dtype):
    # alpha_ref: (1,) f32 in SMEM.  x_ref/o_ref: (tr, tc) tiles.
    # w_ref/b_ref: (1, tc) (channels_last) or (tr, 1) (channels_first);
    # both broadcast against the (tr, tc) tile.
    a = alpha_ref[0].astype(compute_dtype)
    x = x_ref[...].astype(compute_dtype)
    y = jnp.tanh(a * x)
    w = w_ref[...].astype(compute_dtype)
    b = b_ref[...].astype(compute_dtype)
    o_ref[...] = (y * w + b).astype(o_ref.dtype)


# ---------------------------------------------------------------------------
# Tile planning + 2-D launcher
# ---------------------------------------------------------------------------
def _plan_tiles(rows, cols, itemsize, row_step, tile_bytes, row_overhead=0):
    """Pick (tr, tc).  tr is a multiple of row_step (or the full row extent),
    tc a multiple of 128 (or the full column extent); both are sized purely
    from the per-tile byte budget (no artificial cap)."""
    if cols <= _LANE_ALIGN:
        tc = cols
    else:
        fit_cols = (tile_bytes // max(1, row_step) - row_overhead) // itemsize
        max_tc = max(_LANE_ALIGN, (fit_cols // _LANE_ALIGN) * _LANE_ALIGN)
        tc = max(_LANE_ALIGN,
                 min((cols // _LANE_ALIGN) * _LANE_ALIGN, max_tc))

    row_budget = max(row_step,
                     tile_bytes // max(1, tc * itemsize + row_overhead))
    if rows <= row_step:
        tr = rows
    else:
        tr = max(row_step, (min(rows, row_budget) // row_step) * row_step)

    # Megacore / v7x guard: avoid a degenerate (1, 1) grid so both
    # TensorCores (and their DMA engines) get work when rows allow a split.
    if pl.cdiv(rows, tr) == 1 and pl.cdiv(cols, tc) == 1 and rows > row_step:
        tr = min(tr, _round_up(pl.cdiv(rows, 2), row_step))
    return tr, tc


def _launch(x2, alpha, w2, b2, w_spec, param_block, tr, tc, compute_dtype):
    rows, cols = x2.shape
    itemsize = x2.dtype.itemsize
    _, vmem_cap = _hw_config()

    grid = (pl.cdiv(rows, tr), pl.cdiv(cols, tc))
    alpha1 = jnp.asarray(alpha, jnp.float32).reshape(1)   # 1-D SMEM scalar

    n_elem = rows * cols
    cost = pl.CostEstimate(
        flops=3 * n_elem,
        transcendentals=n_elem,
        bytes_accessed=2 * n_elem * itemsize,
    )

    def padded(r, c, isz):                  # VMEM footprint of one buffer
        return _round_up(r, _ROW_ALIGN) * _round_up(c, _LANE_ALIGN) * isz

    p_isz = w2.dtype.itemsize
    needed = (4 * padded(tr, tc, itemsize)                       # x + out, 2x
              + 4 * padded(param_block[0], param_block[1], p_isz)  # w + b, 2x
              + (1 << 20))                                       # slack
    vmem_limit = int(min(max(needed, 16 << 20), vmem_cap))

    kernel = functools.partial(_dyt_kernel, compute_dtype=compute_dtype)
    return pl.pallas_call(
        kernel,
        out_shape=jax.ShapeDtypeStruct((rows, cols), x2.dtype),
        grid=grid,
        in_specs=[
            pl.BlockSpec(memory_space=pltpu.MemorySpace.SMEM),   # alpha
            pl.BlockSpec((tr, tc), lambda i, j: (i, j)),         # x
            w_spec,                                              # weight
            w_spec,                                              # bias
        ],
        out_specs=pl.BlockSpec((tr, tc), lambda i, j: (i, j)),
        compiler_params=pltpu.CompilerParams(
            dimension_semantics=("parallel", "parallel"),
            vmem_limit_bytes=vmem_limit,
        ),
        cost_estimate=cost,
    )(alpha1, x2, w2, b2)


# ---------------------------------------------------------------------------
# Mode wrappers
# ---------------------------------------------------------------------------
def dyt_channels_last(x, alpha, weight, bias):
    """x: (..., C) channels-last. weight/bias: (C,). alpha: scalar."""
    orig_shape = x.shape
    C = weight.shape[0]
    M = x.size // C
    itemsize = x.dtype.itemsize
    row_align = max(_ROW_ALIGN, 32 // itemsize)     # dtype-aware sublane pack
    tile_bytes, _ = _hw_config()
    cdt = _compute_dtype(x.dtype)

    x2 = x.reshape(M, C)
    w2 = weight.reshape(1, C)
    b2 = bias.reshape(1, C)
    if C % _LANE_ALIGN != 0:
        # Lane-dense repack: view as (M*C/L, L), L = lcm(C, 128), params tiled
        # to length L -> unmasked full-lane stores.  Only when it also yields
        # full sublane packing (>= row_align rows).
        L = math.lcm(C, _LANE_ALIGN)
        if L <= 4096 and (M * C) % L == 0 and (M * C) // L >= row_align:
            reps = L // C
            x2 = x.reshape((M * C) // L, L)
            w2 = jnp.tile(weight, reps).reshape(1, L)
            b2 = jnp.tile(bias, reps).reshape(1, L)
        # TODO(synk): main+tail split when (M*C) % L != 0 and C < 128 so the
        # bulk still gets unmasked lane-dense stores.

    rows, cols = x2.shape
    tr, tc = _plan_tiles(rows, cols, itemsize, row_align, tile_bytes)
    w_spec = pl.BlockSpec((1, tc), lambda i, j: (0, j))
    out = _launch(x2, alpha, w2, b2, w_spec, (1, tc), tr, tc, cdt)
    return out.reshape(orig_shape)


def dyt_channels_first(x, alpha, weight, bias):
    """x: (N, C, H, W) NCHW. weight/bias: (C,). alpha: scalar."""
    N, C, H, W = x.shape
    HW = H * W
    itemsize = x.dtype.itemsize
    row_align = max(_ROW_ALIGN, 32 // itemsize, 32 // weight.dtype.itemsize)
    tile_bytes, _ = _hw_config()
    cdt = _compute_dtype(x.dtype)

    rows = N * C
    x2 = x.reshape(rows, HW)
    # (tr, 1) param blocks pad to 128 lanes in VMEM -> account per-row bytes.
    row_overhead = 2 * _LANE_ALIGN * weight.dtype.itemsize

    step = math.lcm(C, row_align)
    if step <= 4096:
        # Constant-parameter path: tr is a multiple of C, so every row block
        # sees the same per-row weight/bias pattern -> one (tr, 1) param block
        # with index_map (0, 0) (fetched once), no (N*C,) materialization.
        tr, tc = _plan_tiles(rows, HW, itemsize, step, tile_bytes,
                             row_overhead=row_overhead)
        if tr % C == 0:
            reps = tr // C
            w2 = jnp.tile(weight, reps).reshape(tr, 1)
            b2 = jnp.tile(bias, reps).reshape(tr, 1)
            w_spec = pl.BlockSpec((tr, 1), lambda i, j: (0, 0))
            out = _launch(x2, alpha, w2, b2, w_spec, (tr, 1), tr, tc, cdt)
            return out.reshape(N, C, H, W)

    # Fallback: per-row params materialized once at (N*C, 1), tiled with x.
    tr, tc = _plan_tiles(rows, HW, itemsize, row_align, tile_bytes,
                         row_overhead=row_overhead)
    w2 = jnp.tile(weight, N).reshape(rows, 1)
    b2 = jnp.tile(bias, N).reshape(rows, 1)
    w_spec = pl.BlockSpec((tr, 1), lambda i, j: (i, 0))
    out = _launch(x2, alpha, w2, b2, w_spec, (tr, 1), tr, tc, cdt)
    return out.reshape(N, C, H, W)


def dynamic_tanh(x, alpha, weight, bias, channels_last):
    if channels_last:
        return dyt_channels_last(x, alpha, weight, bias)
    return dyt_channels_first(x, alpha, weight, bias)


# Pure-JAX reference (mirrors the PyTorch forward exactly)
def dynamic_tanh_ref(x, alpha, weight, bias, channels_last):
    y = jnp.tanh(alpha * x)
    if channels_last:
        return y * weight + bias
    return y * weight[:, None, None] + bias[:, None, None]


if __name__ == "__main__":
    key = jax.random.PRNGKey(0)
    k1, k2 = jax.random.split(key)

    alpha_init_value = 0.5

    # ---- channels_first (NCHW), normalized_shape = C = 4 ----
    N, C, H, W = 2, 4, 16, 16
    x_cf = jax.random.normal(k1, (N, C, H, W), dtype=jnp.float32)
    alpha_cf = jnp.float32(alpha_init_value)
    weight_cf = jnp.ones((C,), jnp.float32) + 0.1 * jnp.arange(C, dtype=jnp.float32)
    bias_cf = jnp.zeros((C,), jnp.float32) + 0.01 * jnp.arange(C, dtype=jnp.float32)

    out_cf = dynamic_tanh(x_cf, alpha_cf, weight_cf, bias_cf,
                          channels_last=False)
    jax.block_until_ready(out_cf)
    ref_cf = dynamic_tanh_ref(x_cf, alpha_cf, weight_cf, bias_cf,
                              channels_last=False)
    assert out_cf.shape == (N, C, H, W)
    assert jnp.allclose(out_cf, ref_cf, atol=1e-6, rtol=1e-6)

    # ---- channels_last (..., hidden), normalized_shape = hidden = 32 ----
    B, S, Dh = 2, 8, 32
    x_cl = jax.random.normal(k2, (B, S, Dh), dtype=jnp.float32)
    alpha_cl = jnp.float32(alpha_init_value)
    weight_cl = jnp.ones((Dh,), jnp.float32) + 0.05 * jnp.arange(
        Dh, dtype=jnp.float32)
    bias_cl = jnp.zeros((Dh,), jnp.float32) - 0.02 * jnp.arange(
        Dh, dtype=jnp.float32)

    out_cl = dynamic_tanh(x_cl, alpha_cl, weight_cl, bias_cl,
                          channels_last=True)
    jax.block_until_ready(out_cl)
    ref_cl = dynamic_tanh_ref(x_cl, alpha_cl, weight_cl, bias_cl,
                              channels_last=True)
    assert out_cl.shape == (B, S, Dh)
    assert jnp.allclose(out_cl, ref_cl, atol=1e-6, rtol=1e-6)

    print("KERNEL_OK")
</pallas_src>

<mosaic_0001>
module attributes {stable_mosaic.version = 11 : i64} {
  func.func @_dyt_kernel(%arg0: i32, %arg1: i32, %arg2: memref<1xf32, #tpu.memory_space<smem>>, %arg3: memref<8x256xf32, #tpu.memory_space<vmem>>, %arg4: memref<8x1xf32, #tpu.memory_space<vmem>>, %arg5: memref<8x1xf32, #tpu.memory_space<vmem>>, %arg6: memref<8x256xf32, #tpu.memory_space<vmem>>) attributes {dimension_semantics = [#tpu.dimension_semantics<parallel>, #tpu.dimension_semantics<parallel>], iteration_bounds = array<i64: 1, 1>, scalar_prefetch = 0 : i64, scratch_operands = 0 : i64, tpu.core_type = #tpu.core_type<tc>, window_params = [{transform_indices = @transform_0, window_bounds = array<i64: 1>}, {transform_indices = @transform_1, window_bounds = array<i64: 8, 256>}, {pipeline_mode = #tpu.pipeline_mode<synchronous>, transform_indices = @transform_2, window_bounds = array<i64: 8, 1>}, {pipeline_mode = #tpu.pipeline_mode<synchronous>, transform_indices = @transform_3, window_bounds = array<i64: 8, 1>}, {transform_indices = @transform_4, window_bounds = array<i64: 8, 256>}]} {
    %c0 = arith.constant 0 : index
    %0 = memref.load %arg2[%c0] : memref<1xf32, #tpu.memory_space<smem>>
    %c0_0 = arith.constant 0 : index
    %c0_1 = arith.constant 0 : index
    %1 = vector.load %arg3[%c0_0, %c0_1] : memref<8x256xf32, #tpu.memory_space<vmem>>, vector<8x256xf32>
    %2 = vector.broadcast %0 : f32 to vector<8x256xf32>
    %3 = arith.mulf %2, %1 : vector<8x256xf32>
    %4 = math.tanh %3 : vector<8x256xf32>
    %c0_2 = arith.constant 0 : index
    %c0_3 = arith.constant 0 : index
    %5 = vector.load %arg4[%c0_2, %c0_3] : memref<8x1xf32, #tpu.memory_space<vmem>>, vector<8x1xf32>
    %c0_4 = arith.constant 0 : index
    %c0_5 = arith.constant 0 : index
    %6 = vector.load %arg5[%c0_4, %c0_5] : memref<8x1xf32, #tpu.memory_space<vmem>>, vector<8x1xf32>
    %7 = vector.broadcast %5 : vector<8x1xf32> to vector<8x256xf32>
    %8 = arith.mulf %4, %7 : vector<8x256xf32>
    %9 = vector.broadcast %6 : vector<8x1xf32> to vector<8x256xf32>
    %10 = arith.addf %8, %9 : vector<8x256xf32>
    %c0_6 = arith.constant 0 : index
    %c0_7 = arith.constant 0 : index
    %11 = vector.load %arg6[%c0_6, %c0_7] : memref<8x256xf32, #tpu.memory_space<vmem>>, vector<8x256xf32>
    tpu.vector_store %arg6[%c0_6, %c0_7], %10 {strides = array<i32>} : memref<8x256xf32, #tpu.memory_space<vmem>>, vector<8x256xf32>,
    return
  }
  func.func @transform_0(%arg0: i32, %arg1: i32) -> i32 {
    %c0_i32 = arith.constant 0 : i32
    %c0_i32_0 = arith.constant 0 : i32
    return %c0_i32 : i32
  }
  func.func @transform_1(%arg0: i32, %arg1: i32) -> (i32, i32) {
    %c0_i32 = arith.constant 0 : i32
    return %arg0, %arg1 : i32, i32
  }
  func.func @transform_2(%arg0: i32, %arg1: i32) -> (i32, i32) {
    %c0_i32 = arith.constant 0 : i32
    %c0_i32_0 = arith.constant 0 : i32
    %c0_i32_1 = arith.constant 0 : i32
    return %c0_i32, %c0_i32_0 : i32, i32
  }
  func.func @transform_3(%arg0: i32, %arg1: i32) -> (i32, i32) {
    %c0_i32 = arith.constant 0 : i32
    %c0_i32_0 = arith.constant 0 : i32
    %c0_i32_1 = arith.constant 0 : i32
    return %c0_i32, %c0_i32_0 : i32, i32
  }
  func.func @transform_4(%arg0: i32, %arg1: i32) -> (i32, i32) {
    %c0_i32 = arith.constant 0 : i32
    return %arg0, %arg1 : i32, i32
  }
}

</mosaic_0001>

<bundles_post_ra>
// kernel: tpu_custom_call.1
= control target key start
LH: loop header
LB: loop body
LE: loop exit
PB: predicated region body
PF: predicated region fallthrough
CT: control target
= control target key end

     0   :  { %v88_v1 = vmov 0   ;;  %s133_s0 = inlined_call_operand.<no memory space> [shape: f32[1], index: 0, kind: input, shape index: {}]   ;;  %s134_s1 = inlined_call_operand.vmem [shape: f32[8,256], index: 1, kind: input, shape index: {}]   ;;  %s135_s2 = inlined_call_operand.vmem [shape: f32[8,1], index: 2, kind: input, shape index: {}]   ;;  %s136_s3 = inlined_call_operand.vmem [shape: f32[8,1], index: 3, kind: input, shape index: {}]   ;;  %s137_s4 = inlined_call_operand.hbm [shape: f32[8,256], index: 4, kind: output, shape index: {}]  }
   0x1   :  { %v27_v0 = vld [vmem:[%s135_s2] sm:$0xff]  ;;  %61 = vset.pattern.permute.xlu0 %v88_v1 }
   0x2   :  { %10 = vsyncpa [#allocation4], 0  ;;  %31 = vperm.xlu0 %61, %v27_v0   ;;  %v28_v2 = vld [vmem:[%s136_s3] sm:$0xff]  ;;  %v22_v4 = vstv %s133_s0  ;;  %v21_v5 = vld [vmem:[%s134_s1 + $0x8] sm:$0xff]  ;;  %s89_s2 = smov [#allocation3]  }
   0x3   :  { %v20_v3 = vld [vmem:[%s134_s1] sm:$0xff]  ;;  %v24_v7 = vmul.f32 %v22_v4, %v21_v5  ;;  %s51_s3 = sshll.u32 %s89_s2, 4  ;;  %s52_s3 = int_to_ptr.vmem [resolvable:$true] %s51_s3 }
   0x4   :  { %v23_v6 = vmul.f32 %v22_v4, %v20_v3  ;;  %s66_s0 = scalar_lea.vmem %s52_s3, 256  ;;  %p71_p1 = scmp.lt.s32.totalorder %s52_s3, %s52_s3 }
   0x5   :  { %p67_p0 = scmp.ne.s32.totalorder %s52_s3, %s66_s0  ;;  %p72_p2 = scmp.lt.s32.totalorder %s66_s0, %s66_s0 }
   0x6   :  { %38 = vperm.xlu0 %61, %v28_v2   ;;  %62 = vtanh.f32 %v23_v6 }
   0x7   :  { %64 = vtanh.f32 %v24_v7  ;;  %p73_p3 = por %p72_p2, %p71_p1 }
   0x9   :  { %p74_p4 = pnand %p73_p3, %p67_p0 }
  0x13   :  { %v63_v8 = vpop.eup %62 }
  0x14   :  { %v65_v9 = vpop.eup %64 }
  0x7d   :  { %v32_v10 = vpop.permute.xlu0 %31 }
  0x7e   :  { %v34_v11 = vmul.f32 %v63_v8, %v32_v10  ;;  %v35_v12 = vmul.f32 %v65_v9, %v32_v10 }
  0x81   :  { %v39_v13 = vpop.permute.xlu0 %38 }
  0x82   :  { %v41_v14 = vadd.f32 %v39_v13, %v34_v11  ;;  %v42_v15 = vadd.f32 %v39_v13, %v35_v12 }
  0x84   :  { %43 = vst [vmem:[#allocation3] sm:$0xff] %v41_v14  ;;  %44 = vst [vmem:[#allocation3 + $0x8] sm:$0xff] %v42_v15 }
  0x85   :  { %77 = shalt.err (!%p74_p4)
}
  0x86   :  { %54 = dma.vmem_to_hbm [thread:$0]  %s52_s3, 256, %s137_s4, [#allocation4]  }
  0x87   :  { %86 = dma.done.wait [#allocation4], 256  }
  0x88   :  { %87 = vsyncadd [#allocation4], 4294967040 }
  0x89   :  { %58 = vsyncpa [#allocation4], 1 }

</bundles_post_ra>
